<compile_context>
chip_gen: v7x
topology: tpu7x:2x2x1
jax: 0.10.0
libtpu: 0.0.40
codegen_flags: <defaults>
</compile_context>

<pallas_src>
import functools

import jax
import jax.numpy as jnp
from jax.experimental import pallas as pl
from jax.experimental.pallas import tpu as pltpu

NSTATE = 4
S1 = 60
S2 = 30
LATENT = 2
NEG_SLOPE = 0.05

PAD = 64          # every layer width zero-padded to 64 -> one packed weight tensor
NUM_LAYERS = 6


def _leaky_relu(x):
    return jnp.where(x >= 0, x, NEG_SLOPE * x)


def _round_up(a, b):
    return ((a + b - 1) // b) * b


def autoencoder_kernel(x_ref, w_ref, b_ref, o_ref):
    """Fused encoder+decoder MLP, feature-major.

    x_ref: (NSTATE, tm)     input, batch on the lane axis
    w_ref: (6, PAD, PAD)    zero-padded weights; layer i is w_ref[i] in (out, in) form
    b_ref: (6, PAD, 1)      zero-padded biases
    o_ref: (NSTATE, tm)     output, lane-dense
    """
    x = x_ref[...]                                                    # (4, tm)

    # ---- encoder ----
    w1 = w_ref[0][:, :NSTATE]                                         # (64, 4)
    h = jnp.dot(w1, x, preferred_element_type=jnp.float32) + b_ref[0]
    h = _leaky_relu(h)                                                # (64, tm); rows >= S1 are 0

    h = jnp.dot(w_ref[1], h, preferred_element_type=jnp.float32) + b_ref[1]
    h = _leaky_relu(h)                                                # rows >= S2 are 0

    h = jnp.dot(w_ref[2], h, preferred_element_type=jnp.float32) + b_ref[2]
    # rows >= LATENT become sigmoid(0)=0.5 but hit the zero columns of layer 4.
    z = jax.nn.sigmoid(h)                                             # exp/logistic -> EUP

    # ---- decoder ----
    h = jnp.dot(w_ref[3], z, preferred_element_type=jnp.float32) + b_ref[3]
    h = _leaky_relu(h)                                                # (64, tm)

    h = jnp.dot(w_ref[4], h, preferred_element_type=jnp.float32) + b_ref[4]
    h = _leaky_relu(h)                                                # (64, tm)

    w6 = w_ref[5][:NSTATE, :]                                         # (4, 64)
    out = jnp.dot(w6, h, preferred_element_type=jnp.float32) + b_ref[5][:NSTATE]

    o_ref[...] = out.astype(o_ref.dtype)                              # (4, tm) lane-dense store


def init_params(key, nstate=NSTATE):
    """PyTorch-style init; weights in nn.Linear convention (out_features, in_features)."""
    dims = [
        (nstate, S1), (S1, S2), (S2, LATENT),   # encoder
        (LATENT, S2), (S2, S1), (S1, nstate),   # decoder
    ]
    params = []
    for (fan_in, fan_out) in dims:
        key, kw, kb = jax.random.split(key, 3)
        bound = 1.0 / float(fan_in) ** 0.5
        w = jax.random.uniform(kw, (fan_out, fan_in), jnp.float32, -bound, bound)
        b = jax.random.uniform(kb, (fan_out,), jnp.float32, -bound, bound)
        params.append((w, b))
    return params


def pack_params(params):
    """Zero-pad every layer to (PAD, PAD)/(PAD, 1) and stack into two arrays."""
    w_all = jnp.zeros((NUM_LAYERS, PAD, PAD), jnp.float32)
    b_all = jnp.zeros((NUM_LAYERS, PAD, 1), jnp.float32)
    for i, (w, b) in enumerate(params):
        o, n = w.shape
        w_all = w_all.at[i, :o, :n].set(w)
        b_all = b_all.at[i, :o, 0].set(b)
    return w_all, b_all


@functools.partial(jax.jit, static_argnames=("tm",))
def autoencoder_forward(x, w_all, b_all, *, tm=512):
    """x: (B, NSTATE) float32 -> (B, NSTATE) float32."""
    B, nstate = x.shape
    assert nstate == NSTATE

    # Batch sits on the lane axis -> tile must be a multiple of 128; pad the tail.
    tm_eff = _round_up(min(tm, _round_up(B, 128)), 128)
    B_pad = _round_up(B, tm_eff)
    grid = (B_pad // tm_eff,)

    # Feature-major input slab (nstate, B_pad); pad columns are zeros and discarded later.
    xt = jnp.pad(x, ((0, B_pad - B), (0, 0))).T

    out_t = pl.pallas_call(
        autoencoder_kernel,
        out_shape=jax.ShapeDtypeStruct((nstate, B_pad), jnp.float32),
        grid_spec=pltpu.PrefetchScalarGridSpec(
            num_scalar_prefetch=0,
            grid=grid,
            in_specs=[
                pl.BlockSpec((nstate, tm_eff), lambda i: (0, i)),
                pl.BlockSpec(w_all.shape, lambda i: (0, 0, 0)),   # VMEM-resident, fetched once
                pl.BlockSpec(b_all.shape, lambda i: (0, 0, 0)),
            ],
            out_specs=pl.BlockSpec((nstate, tm_eff), lambda i: (0, i)),
        ),
        compiler_params=pltpu.CompilerParams(
            dimension_semantics=("parallel",),   # batch tiles shard across TCs (v7x)
        ),
    )(xt, w_all, b_all)

    return out_t.T[:B]


def autoencoder_ref(x, params):
    """Pure-JAX reference (weights in (out, in) convention)."""
    (w1, b1), (w2, b2), (w3, b3), (w4, b4), (w5, b5), (w6, b6) = params
    h = _leaky_relu(x @ w1.T + b1)
    h = _leaky_relu(h @ w2.T + b2)
    z = jax.nn.sigmoid(h @ w3.T + b3)
    h = _leaky_relu(z @ w4.T + b4)
    h = _leaky_relu(h @ w5.T + b5)
    return h @ w6.T + b6


if __name__ == "__main__":
    key = jax.random.PRNGKey(0)
    kp, kx = jax.random.split(key)

    params = init_params(kp, nstate=NSTATE)
    w_all, b_all = pack_params(params)

    batch = 16
    x = jax.random.normal(kx, (batch, NSTATE), dtype=jnp.float32)

    out = autoencoder_forward(x, w_all, b_all, tm=512)
    out = jax.block_until_ready(out)

    ref = autoencoder_ref(x, params)
    assert out.shape == (batch, NSTATE)
    assert jnp.allclose(out, ref, atol=2e-5, rtol=2e-5), "mismatch vs reference"

    print("KERNEL_OK")
</pallas_src>

<mosaic_0001>
module attributes {stable_mosaic.version = 11 : i64} {
  func.func @autoencoder_kernel(%arg0: i32, %arg1: memref<4x128xf32, #tpu.memory_space<vmem>>, %arg2: memref<6x64x64xf32, #tpu.memory_space<vmem>>, %arg3: memref<6x64x1xf32, #tpu.memory_space<vmem>>, %arg4: memref<4x128xf32, #tpu.memory_space<vmem>>) attributes {dimension_semantics = [#tpu.dimension_semantics<parallel>], iteration_bounds = array<i64: 1>, scalar_prefetch = 0 : i64, scratch_operands = 0 : i64, tpu.core_type = #tpu.core_type<tc>, window_params = [{transform_indices = @transform_0, window_bounds = array<i64: 4, 128>}, {pipeline_mode = #tpu.pipeline_mode<synchronous>, transform_indices = @transform_1, window_bounds = array<i64: 6, 64, 64>}, {pipeline_mode = #tpu.pipeline_mode<synchronous>, transform_indices = @transform_2, window_bounds = array<i64: 6, 64, 1>}, {transform_indices = @transform_3, window_bounds = array<i64: 4, 128>}]} {
    %c0 = arith.constant 0 : index
    %c0_0 = arith.constant 0 : index
    %0 = vector.load %arg1[%c0, %c0_0] : memref<4x128xf32, #tpu.memory_space<vmem>>, vector<4x128xf32>
    %c0_1 = arith.constant 0 : index
    %c0_2 = arith.constant 0 : index
    %c0_3 = arith.constant 0 : index
    %1 = vector.load %arg2[%c0_1, %c0_2, %c0_3] : memref<6x64x64xf32, #tpu.memory_space<vmem>>, vector<1x64x64xf32>
    %2 = vector.shape_cast %1 : vector<1x64x64xf32> to vector<64x64xf32>
    %3 = vector.extract_strided_slice %2 {offsets = [0, 0], sizes = [64, 4], strides = [1, 1]} : vector<64x64xf32> to vector<64x4xf32>
    %cst = arith.constant dense<0.000000e+00> : vector<64x128xf32>
    %4 = tpu.matmul %3, %0, %cst {dimension_numbers = #tpu.dot_dimension_numbers<[1], [0], [0], [1], [0, 0, 1, 1], [], []>} : vector<64x4xf32>, vector<4x128xf32>, vector<64x128xf32> -> vector<64x128xf32>
    %c0_4 = arith.constant 0 : index
    %c0_5 = arith.constant 0 : index
    %c0_6 = arith.constant 0 : index
    %5 = vector.load %arg3[%c0_4, %c0_5, %c0_6] : memref<6x64x1xf32, #tpu.memory_space<vmem>>, vector<1x64x1xf32>
    %6 = vector.shape_cast %5 : vector<1x64x1xf32> to vector<64x1xf32>
    %7 = vector.broadcast %6 : vector<64x1xf32> to vector<64x128xf32>
    %8 = arith.addf %4, %7 : vector<64x128xf32>
    %cst_7 = arith.constant 0.000000e+00 : f32
    %9 = vector.broadcast %cst_7 : f32 to vector<64x128xf32>
    %10 = arith.cmpf oge, %8, %9 : vector<64x128xf32>
    %cst_8 = arith.constant 5.000000e-02 : f32
    %11 = vector.broadcast %cst_8 : f32 to vector<64x128xf32>
    %12 = arith.mulf %11, %8 : vector<64x128xf32>
    %13 = arith.select %10, %8, %12 : vector<64x128xi1>, vector<64x128xf32>
    %c1 = arith.constant 1 : index
    %c0_9 = arith.constant 0 : index
    %c0_10 = arith.constant 0 : index
    %14 = vector.load %arg2[%c1, %c0_9, %c0_10] : memref<6x64x64xf32, #tpu.memory_space<vmem>>, vector<1x64x64xf32>
    %15 = vector.shape_cast %14 : vector<1x64x64xf32> to vector<64x64xf32>
    %cst_11 = arith.constant dense<0.000000e+00> : vector<64x128xf32>
    %16 = tpu.matmul %15, %13, %cst_11 {dimension_numbers = #tpu.dot_dimension_numbers<[1], [0], [0], [1], [0, 0, 1, 1], [], []>} : vector<64x64xf32>, vector<64x128xf32>, vector<64x128xf32> -> vector<64x128xf32>
    %c1_12 = arith.constant 1 : index
    %c0_13 = arith.constant 0 : index
    %c0_14 = arith.constant 0 : index
    %17 = vector.load %arg3[%c1_12, %c0_13, %c0_14] : memref<6x64x1xf32, #tpu.memory_space<vmem>>, vector<1x64x1xf32>
    %18 = vector.shape_cast %17 : vector<1x64x1xf32> to vector<64x1xf32>
    %19 = vector.broadcast %18 : vector<64x1xf32> to vector<64x128xf32>
    %20 = arith.addf %16, %19 : vector<64x128xf32>
    %cst_15 = arith.constant 0.000000e+00 : f32
    %21 = vector.broadcast %cst_15 : f32 to vector<64x128xf32>
    %22 = arith.cmpf oge, %20, %21 : vector<64x128xf32>
    %cst_16 = arith.constant 5.000000e-02 : f32
    %23 = vector.broadcast %cst_16 : f32 to vector<64x128xf32>
    %24 = arith.mulf %23, %20 : vector<64x128xf32>
    %25 = arith.select %22, %20, %24 : vector<64x128xi1>, vector<64x128xf32>
    %c2 = arith.constant 2 : index
    %c0_17 = arith.constant 0 : index
    %c0_18 = arith.constant 0 : index
    %26 = vector.load %arg2[%c2, %c0_17, %c0_18] : memref<6x64x64xf32, #tpu.memory_space<vmem>>, vector<1x64x64xf32>
    %27 = vector.shape_cast %26 : vector<1x64x64xf32> to vector<64x64xf32>
    %cst_19 = arith.constant dense<0.000000e+00> : vector<64x128xf32>
    %28 = tpu.matmul %27, %25, %cst_19 {dimension_numbers = #tpu.dot_dimension_numbers<[1], [0], [0], [1], [0, 0, 1, 1], [], []>} : vector<64x64xf32>, vector<64x128xf32>, vector<64x128xf32> -> vector<64x128xf32>
    %c2_20 = arith.constant 2 : index
    %c0_21 = arith.constant 0 : index
    %c0_22 = arith.constant 0 : index
    %29 = vector.load %arg3[%c2_20, %c0_21, %c0_22] : memref<6x64x1xf32, #tpu.memory_space<vmem>>, vector<1x64x1xf32>
    %30 = vector.shape_cast %29 : vector<1x64x1xf32> to vector<64x1xf32>
    %31 = vector.broadcast %30 : vector<64x1xf32> to vector<64x128xf32>
    %32 = arith.addf %28, %31 : vector<64x128xf32>
    %33 = arith.negf %32 : vector<64x128xf32>
    %34 = math.exp %33 : vector<64x128xf32>
    %cst_23 = arith.constant 1.000000e+00 : f32
    %35 = vector.broadcast %cst_23 : f32 to vector<64x128xf32>
    %36 = arith.addf %35, %34 : vector<64x128xf32>
    %37 = arith.divf %35, %36 : vector<64x128xf32>
    %c3 = arith.constant 3 : index
    %c0_24 = arith.constant 0 : index
    %c0_25 = arith.constant 0 : index
    %38 = vector.load %arg2[%c3, %c0_24, %c0_25] : memref<6x64x64xf32, #tpu.memory_space<vmem>>, vector<1x64x64xf32>
    %39 = vector.shape_cast %38 : vector<1x64x64xf32> to vector<64x64xf32>
    %cst_26 = arith.constant dense<0.000000e+00> : vector<64x128xf32>
    %40 = tpu.matmul %39, %37, %cst_26 {dimension_numbers = #tpu.dot_dimension_numbers<[1], [0], [0], [1], [0, 0, 1, 1], [], []>} : vector<64x64xf32>, vector<64x128xf32>, vector<64x128xf32> -> vector<64x128xf32>
    %c3_27 = arith.constant 3 : index
    %c0_28 = arith.constant 0 : index
    %c0_29 = arith.constant 0 : index
    %41 = vector.load %arg3[%c3_27, %c0_28, %c0_29] : memref<6x64x1xf32, #tpu.memory_space<vmem>>, vector<1x64x1xf32>
    %42 = vector.shape_cast %41 : vector<1x64x1xf32> to vector<64x1xf32>
    %43 = vector.broadcast %42 : vector<64x1xf32> to vector<64x128xf32>
    %44 = arith.addf %40, %43 : vector<64x128xf32>
    %cst_30 = arith.constant 0.000000e+00 : f32
    %45 = vector.broadcast %cst_30 : f32 to vector<64x128xf32>
    %46 = arith.cmpf oge, %44, %45 : vector<64x128xf32>
    %cst_31 = arith.constant 5.000000e-02 : f32
    %47 = vector.broadcast %cst_31 : f32 to vector<64x128xf32>
    %48 = arith.mulf %47, %44 : vector<64x128xf32>
    %49 = arith.select %46, %44, %48 : vector<64x128xi1>, vector<64x128xf32>
    %c4 = arith.constant 4 : index
    %c0_32 = arith.constant 0 : index
    %c0_33 = arith.constant 0 : index
    %50 = vector.load %arg2[%c4, %c0_32, %c0_33] : memref<6x64x64xf32, #tpu.memory_space<vmem>>, vector<1x64x64xf32>
    %51 = vector.shape_cast %50 : vector<1x64x64xf32> to vector<64x64xf32>
    %cst_34 = arith.constant dense<0.000000e+00> : vector<64x128xf32>
    %52 = tpu.matmul %51, %49, %cst_34 {dimension_numbers = #tpu.dot_dimension_numbers<[1], [0], [0], [1], [0, 0, 1, 1], [], []>} : vector<64x64xf32>, vector<64x128xf32>, vector<64x128xf32> -> vector<64x128xf32>
    %c4_35 = arith.constant 4 : index
    %c0_36 = arith.constant 0 : index
    %c0_37 = arith.constant 0 : index
    %53 = vector.load %arg3[%c4_35, %c0_36, %c0_37] : memref<6x64x1xf32, #tpu.memory_space<vmem>>, vector<1x64x1xf32>
    %54 = vector.shape_cast %53 : vector<1x64x1xf32> to vector<64x1xf32>
    %55 = vector.broadcast %54 : vector<64x1xf32> to vector<64x128xf32>
    %56 = arith.addf %52, %55 : vector<64x128xf32>
    %cst_38 = arith.constant 0.000000e+00 : f32
    %57 = vector.broadcast %cst_38 : f32 to vector<64x128xf32>
    %58 = arith.cmpf oge, %56, %57 : vector<64x128xf32>
    %cst_39 = arith.constant 5.000000e-02 : f32
    %59 = vector.broadcast %cst_39 : f32 to vector<64x128xf32>
    %60 = arith.mulf %59, %56 : vector<64x128xf32>
    %61 = arith.select %58, %56, %60 : vector<64x128xi1>, vector<64x128xf32>
    %c5 = arith.constant 5 : index
    %c0_40 = arith.constant 0 : index
    %c0_41 = arith.constant 0 : index
    %62 = vector.load %arg2[%c5, %c0_40, %c0_41] : memref<6x64x64xf32, #tpu.memory_space<vmem>>, vector<1x64x64xf32>
    %63 = vector.shape_cast %62 : vector<1x64x64xf32> to vector<64x64xf32>
    %64 = vector.extract_strided_slice %63 {offsets = [0, 0], sizes = [4, 64], strides = [1, 1]} : vector<64x64xf32> to vector<4x64xf32>
    %cst_42 = arith.constant dense<0.000000e+00> : vector<4x128xf32>
    %65 = tpu.matmul %64, %61, %cst_42 {dimension_numbers = #tpu.dot_dimension_numbers<[1], [0], [0], [1], [0, 0, 1, 1], [], []>} : vector<4x64xf32>, vector<64x128xf32>, vector<4x128xf32> -> vector<4x128xf32>
    %c5_43 = arith.constant 5 : index
    %c0_44 = arith.constant 0 : index
    %c0_45 = arith.constant 0 : index
    %66 = vector.load %arg3[%c5_43, %c0_44, %c0_45] : memref<6x64x1xf32, #tpu.memory_space<vmem>>, vector<1x64x1xf32>
    %67 = vector.shape_cast %66 : vector<1x64x1xf32> to vector<64x1xf32>
    %68 = vector.extract_strided_slice %67 {offsets = [0, 0], sizes = [4, 1], strides = [1, 1]} : vector<64x1xf32> to vector<4x1xf32>
    %69 = vector.broadcast %68 : vector<4x1xf32> to vector<4x128xf32>
    %70 = arith.addf %65, %69 : vector<4x128xf32>
    %c0_46 = arith.constant 0 : index
    %c0_47 = arith.constant 0 : index
    %71 = vector.load %arg4[%c0_46, %c0_47] : memref<4x128xf32, #tpu.memory_space<vmem>>, vector<4x128xf32>
    tpu.vector_store %arg4[%c0_46, %c0_47], %70 {strides = array<i32>} : memref<4x128xf32, #tpu.memory_space<vmem>>, vector<4x128xf32>,
    return
  }
  func.func @transform_0(%arg0: i32) -> (i32, i32) {
    %c0_i32 = arith.constant 0 : i32
    %c0_i32_0 = arith.constant 0 : i32
    return %c0_i32, %arg0 : i32, i32
  }
  func.func @transform_1(%arg0: i32) -> (i32, i32, i32) {
    %c0_i32 = arith.constant 0 : i32
    %c0_i32_0 = arith.constant 0 : i32
    %c0_i32_1 = arith.constant 0 : i32
    %c0_i32_2 = arith.constant 0 : i32
    return %c0_i32, %c0_i32_0, %c0_i32_1 : i32, i32, i32
  }
  func.func @transform_2(%arg0: i32) -> (i32, i32, i32) {
    %c0_i32 = arith.constant 0 : i32
    %c0_i32_0 = arith.constant 0 : i32
    %c0_i32_1 = arith.constant 0 : i32
    %c0_i32_2 = arith.constant 0 : i32
    return %c0_i32, %c0_i32_0, %c0_i32_1 : i32, i32, i32
  }
  func.func @transform_3(%arg0: i32) -> (i32, i32) {
    %c0_i32 = arith.constant 0 : i32
    %c0_i32_0 = arith.constant 0 : i32
    return %c0_i32, %arg0 : i32, i32
  }
}

</mosaic_0001>

<bundles_post_ra>
// kernel: autoencoder_forward.1
= control target key start
LH: loop header
LB: loop body
LE: loop exit
PB: predicated region body
PF: predicated region fallthrough
CT: control target
= control target key end

     0   :  { %vm97_vm0 = vcmask 1043456   ;;  %vm72_vm1 = vcmask 31744   ;;  %v1678_v5 = vmov 0   ;;  %s2005_s0 = inlined_call_operand.vmem [shape: f32[4,128], index: 0, kind: input, shape index: {}]   ;;  %s2006_s1 = inlined_call_operand.vmem [shape: f32[6,64,64], index: 1, kind: input, shape index: {}]   ;;  %s2007_s2 = inlined_call_operand.vmem [shape: f32[6,64,1], index: 2, kind: input, shape index: {}]   ;;  %s2008_s3 = inlined_call_operand.hbm [shape: f32[4,128], index: 3, kind: output, shape index: {}]  }
   0x1   :  { %v15_v0 = vld [vmem:[%s2005_s0] sm:$0xf]  ;;  %v17_v2 = vld [vmem:[%s2006_s1 + $0x8] sm:$0xff]  ;;  %v18_v4 = vld [vmem:[%s2006_s1 + $0x10] sm:$0xff]  ;;  %1620 = vset.pattern.permute.xlu0 %v1678_v5  ;;  %1621 = vset.pattern.permute.xlu1 %v1678_v5 }
   0x2   :  { %v16_v1 = vld [vmem:[%s2006_s1] sm:$0xff]  ;;  %1394 = vmatprep.subr.msk.mxu0 %vm97_vm0, %v15_v0  ;;  %v26_v6 = vld [vmem:[%s2007_s2 + $0x10] sm:$0xff]  ;;  %v19_v7 = vld [vmem:[%s2006_s1 + $0x18] sm:$0xff] }
   0x3   :  { %1396 = vmatprep.mubr.msk.f32.mxu0 %vm72_vm1, %v16_v1  ;;  %v24_v3 = vld [vmem:[%s2007_s2] sm:$0xff]  ;;  %1395 = vmatpush3.msk.msra.mxu0 %vm97_vm0, %v15_v0  ;;  %v25_v8 = vld [vmem:[%s2007_s2 + $0x8] sm:$0xff]  ;;  %v27_v10 = vld [vmem:[%s2007_s2 + $0x18] sm:$0xff] }
   0x4   :  { %1397 = vmatmul.mubr.msk.f32.vlgmr.msra.gmra.mrb[0].mxu0 %vm72_vm1, %v17_v2  ;;  %34 = vperm.xlu0 %1620, %v24_v3   ;;  %v20_v9 = vld [vmem:[%s2006_s1 + $0x20] sm:$0xff]  ;;  %v21_v11 = vld [vmem:[%s2006_s1 + $0x28] sm:$0xff]  ;;  %v22_v13 = vld [vmem:[%s2006_s1 + $0x30] sm:$0xff] }
   0x5   :  { %1399 = vmatprep.mubr.msk.f32.mxu0 %vm72_vm1, %v18_v4  ;;  %44 = vperm.xlu1 %1621, %v26_v6   ;;  %v28_v12 = vld [vmem:[%s2007_s2 + $0x20] sm:$0xff]  ;;  %v29_v14 = vld [vmem:[%s2007_s2 + $0x28] sm:$0xff]  ;;  %v23_v15 = vld [vmem:[%s2006_s1 + $0x38] sm:$0xff] }
   0x6   :  { %v30_v16 = vld [vmem:[%s2007_s2 + $0x30] sm:$0xff]  ;;  %v31_v17 = vld [vmem:[%s2007_s2 + $0x38] sm:$0xff]  ;;  %v1213_v18 = vld [vmem:[%s2007_s2 + $0x40] sm:$0xff] }
   0x8   :  { %1400 = vmatmul.mubr.msk.f32.gmra.mrb[2].mxu0 %vm72_vm1, %v19_v7  ;;  %39 = vperm.xlu0 %1620, %v25_v8  }
   0x9   :  { %1402 = vmatprep.mubr.msk.f32.mxu0 %vm72_vm1, %v20_v9  ;;  %49 = vperm.xlu1 %1621, %v27_v10  }
   0xc   :  { %1403 = vmatmul.mubr.msk.f32.gmra.mrb[4].mxu0 %vm72_vm1, %v21_v11  ;;  %54 = vperm.xlu0 %1620, %v28_v12  }
   0xd   :  { %1405 = vmatprep.mubr.msk.f32.mxu0 %vm72_vm1, %v22_v13  ;;  %59 = vperm.xlu1 %1621, %v29_v14  }
  0x10   :  { %1406 = vmatmul.mubr.msk.f32.gmra.mrb[6].mxu0 %vm72_vm1, %v23_v15  ;;  %64 = vperm.xlu0 %1620, %v30_v16  }
  0x11   :  { %69 = vperm.xlu1 %1621, %v31_v17  }
  0x12   :  { %8 = vsyncpa [#allocation3], 0  ;;  %v1214_v19 = vld [vmem:[%s2007_s2 + $0x48] sm:$0xff]  ;;  %v1215_v20 = vld [vmem:[%s2007_s2 + $0x50] sm:$0xff]  ;;  %vm288_vm2 = vcmask 523264   ;;  %s1682_s7 = smov [#allocation2]  }
  0x13   :  { %v1216_v21 = vld [vmem:[%s2007_s2 + $0x58] sm:$0xff]  ;;  %v1217_v22 = vld [vmem:[%s2007_s2 + $0x60] sm:$0xff]  ;;  %v1218_v23 = vld [vmem:[%s2007_s2 + $0x68] sm:$0xff]  ;;  %s1188_s8 = sshll.u32 %s1682_s7, 4  ;;  %s1189_s8 = int_to_ptr.vmem [resolvable:$true] %s1188_s8 }
  0x14   :  { %250 = vperm.xlu0 %1620, %v1213_v18   ;;  %v1219_v24 = vld [vmem:[%s2007_s2 + $0x70] sm:$0xff]  ;;  %v1220_v25 = vld [vmem:[%s2007_s2 + $0x78] sm:$0xff]  ;;  %v1237_v26 = vld [vmem:[%s2007_s2 + $0x80] sm:$0xff]  ;;  %s1654_s9 = scalar_lea.vmem %s1189_s8, 64  ;;  %p1659_p1 = scmp.lt.s32.totalorder %s1189_s8, %s1189_s8 }
  0x15   :  { %255 = vperm.xlu1 %1621, %v1214_v19   ;;  %v1238_v27 = vld [vmem:[%s2007_s2 + $0x88] sm:$0xff]  ;;  %v1239_v28 = vld [vmem:[%s2007_s2 + $0x90] sm:$0xff]  ;;  %v1240_v29 = vld [vmem:[%s2007_s2 + $0x98] sm:$0xff]  ;;  %p1655_p0 = scmp.ne.s32.totalorder %s1189_s8, %s1654_s9  ;;  %p1660_p2 = scmp.lt.s32.totalorder %s1654_s9, %s1654_s9 }
  0x16   :  { %v1241_v30 = vld [vmem:[%s2007_s2 + $0xa0] sm:$0xff]  ;;  %v1242_v31 = vld [vmem:[%s2007_s2 + $0xa8] sm:$0xff]  ;;  %v1243_v32 = vld [vmem:[%s2007_s2 + $0xb0] sm:$0xff] }
  0x17   :  { %v1244_v33 = vld [vmem:[%s2007_s2 + $0xb8] sm:$0xff]  ;;  %v1269_v34 = vld [vmem:[%s2007_s2 + $0xc0] sm:$0xff]  ;;  %v1270_v35 = vld [vmem:[%s2007_s2 + $0xc8] sm:$0xff]  ;;  %p1661_p3 = por %p1660_p2, %p1659_p1 }
  0x18   :  { %260 = vperm.xlu0 %1620, %v1215_v20   ;;  %v1271_v36 = vld [vmem:[%s2007_s2 + $0xd0] sm:$0xff]  ;;  %v1272_v37 = vld [vmem:[%s2007_s2 + $0xd8] sm:$0xff]  ;;  %v1273_v38 = vld [vmem:[%s2007_s2 + $0xe0] sm:$0xff] }
  0x19   :  { %265 = vperm.xlu1 %1621, %v1216_v21   ;;  %v1274_v39 = vld [vmem:[%s2007_s2 + $0xe8] sm:$0xff]  ;;  %v1275_v40 = vld [vmem:[%s2007_s2 + $0xf0] sm:$0xff]  ;;  %v1276_v41 = vld [vmem:[%s2007_s2 + $0xf8] sm:$0xff]  ;;  %p1662_p4 = pnand %p1661_p3, %p1655_p0 }
  0x1a   :  { %v1293_v42 = vld [vmem:[%s2007_s2 + $0x100] sm:$0xff]  ;;  %v1294_v43 = vld [vmem:[%s2007_s2 + $0x108] sm:$0xff]  ;;  %v1295_v44 = vld [vmem:[%s2007_s2 + $0x110] sm:$0xff] }
  0x1b   :  { %v1296_v45 = vld [vmem:[%s2007_s2 + $0x118] sm:$0xff]  ;;  %v1297_v46 = vld [vmem:[%s2007_s2 + $0x120] sm:$0xff]  ;;  %v1298_v47 = vld [vmem:[%s2007_s2 + $0x128] sm:$0xff] }
  0x1c   :  { %270 = vperm.xlu0 %1620, %v1217_v22   ;;  %v1299_v48 = vld [vmem:[%s2007_s2 + $0x130] sm:$0xff]  ;;  %v1300_v49 = vld [vmem:[%s2007_s2 + $0x138] sm:$0xff]  ;;  %v1310_v50 = vld [vmem:[%s2007_s2 + $0x140] sm:$0xff] }
  0x1d   :  { %275 = vperm.xlu1 %1621, %v1218_v23   ;;  %v1205_v51 = vld [vmem:[%s2006_s1 + $0x40] sm:$0xff] }
  0x1e   :  { %1424 = vmatprep.mubr.msk.f32.mxu1 %vm288_vm2, %v1205_v51 }
  0x20   :  { %280 = vperm.xlu0 %1620, %v1219_v24  }
  0x21   :  { %285 = vperm.xlu1 %1621, %v1220_v25  }
  0x24   :  { %462 = vperm.xlu0 %1620, %v1237_v26  }
  0x25   :  { %467 = vperm.xlu1 %1621, %v1238_v27  }
  0x28   :  { %472 = vperm.xlu0 %1620, %v1239_v28  }
  0x29   :  { %477 = vperm.xlu1 %1621, %v1240_v29  }
  0x2c   :  { %482 = vperm.xlu0 %1620, %v1241_v30  }
  0x2d   :  { %487 = vperm.xlu1 %1621, %v1242_v31  }
  0x30   :  { %492 = vperm.xlu0 %1620, %v1243_v32   ;;  %v1206_v32 = vld [vmem:[%s2006_s1 + $0x48] sm:$0xff] }
  0x31   :  { %497 = vperm.xlu1 %1621, %v1244_v33   ;;  %v1207_v33 = vld [vmem:[%s2006_s1 + $0x50] sm:$0xff] }
  0x34   :  { %697 = vperm.xlu0 %1620, %v1269_v34   ;;  %v1208_v34 = vld [vmem:[%s2006_s1 + $0x58] sm:$0xff] }
  0x35   :  { %702 = vperm.xlu1 %1621, %v1270_v35   ;;  %v1209_v35 = vld [vmem:[%s2006_s1 + $0x60] sm:$0xff] }
  0x38   :  { %707 = vperm.xlu0 %1620, %v1271_v36   ;;  %v1210_v36 = vld [vmem:[%s2006_s1 + $0x68] sm:$0xff] }
  0x39   :  { %712 = vperm.xlu1 %1621, %v1272_v37   ;;  %v1211_v37 = vld [vmem:[%s2006_s1 + $0x70] sm:$0xff] }
  0x3c   :  { %717 = vperm.xlu0 %1620, %v1273_v38   ;;  %v1212_v38 = vld [vmem:[%s2006_s1 + $0x78] sm:$0xff] }
  0x3d   :  { %722 = vperm.xlu1 %1621, %v1274_v39   ;;  %v1229_v39 = vld [vmem:[%s2006_s1 + $0x80] sm:$0xff] }
  0x3e   :  { %1452 = vmatprep.mubr.msk.f32.mxu0 %vm288_vm2, %v1229_v39 }
  0x40   :  { %727 = vperm.xlu0 %1620, %v1275_v40  }
  0x41   :  { %732 = vperm.xlu1 %1621, %v1276_v41  }
  0x44   :  { %908 = vperm.xlu0 %1620, %v1293_v42  }
  0x45   :  { %913 = vperm.xlu1 %1621, %v1294_v43  }
  0x48   :  { %918 = vperm.xlu0 %1620, %v1295_v44  }
  0x49   :  { %923 = vperm.xlu1 %1621, %v1296_v45  }
  0x4c   :  { %928 = vperm.xlu0 %1620, %v1297_v46  }
  0x4d   :  { %933 = vperm.xlu1 %1621, %v1298_v47  }
  0x50   :  { %938 = vperm.xlu0 %1620, %v1299_v48  }
  0x51   :  { %943 = vperm.xlu1 %1621, %v1300_v49  }
  0x54   :  { %1105 = vperm.xlu0 %1620, %v1310_v50  }
  0x83   :  { %v35_v52 = vpop.permute.xlu0 %34 }
  0x84   :  { %v45_v53 = vpop.permute.xlu1 %44 }
  0x87   :  { %v40_v54 = vpop.permute.xlu0 %39 }
  0x88   :  { %v50_v55 = vpop.permute.xlu1 %49 }
  0x8b   :  { %v55_v5 = vpop.permute.xlu0 %54 }
  0x8c   :  { %v60_v2 = vpop.permute.xlu1 %59 }
  0x8f   :  { %v65_v20 = vpop.permute.xlu0 %64 }
  0x90   :  { %v70_v17 = vpop.permute.xlu1 %69 }
  0x93   :  { %v251_v41 = vpop.permute.xlu0 %250 }
  0x94   :  { %v256_v40 = vpop.permute.xlu1 %255 }
  0x97   :  { %v261_v44 = vpop.permute.xlu0 %260 }
  0x98   :  { %v266_v42 = vpop.permute.xlu1 %265 }
  0xd7   :  { %v1398_v56 = vpop.f32.mrb[0].mxu0 }
  0xd8   :  { %v173_v57 = vadd.f32 %v1398_v56, %v40_v54  ;;  %v167_v58 = vpop.f32.mrb[1].mxu0  ;;  %v276_v54 = vpop.permute.xlu1 %275 }
  0xd9   :  { %v168_v59 = vadd.f32 %v167_v58, %v35_v52 }
  0xda   :  { %v215_v60 = vmul.f32 0.05, %v173_v57  ;;  %vm207_vm3 = vcmp.ge.f32.partialorder %v173_v57, 0.0 }
  0xdb   :  { %v214_v61 = vmul.f32 0.05, %v168_v59  ;;  %v1401_v62 = vpop.f32.mrb[2].mxu0  ;;  %vm206_vm4 = vcmp.ge.f32.partialorder %v168_v59, 0.0 }
  0xdc   :  { %v183_v63 = vadd.f32 %v1401_v62, %v50_v55  ;;  %v177_v0 = vpop.f32.mrb[3].mxu0  ;;  %v223_v1 = vsel %vm207_vm3, %v173_v57, %v215_v60  ;;  %v271_v57 = vpop.permute.xlu0 %270 }
  0xdd   :  { %v178_v3 = vadd.f32 %v177_v0, %v45_v53  ;;  %v222_v4 = vsel %vm206_vm4, %v168_v59, %v214_v61 }
  0xde   :  { %vm209_vm5 = vcmp.ge.f32.partialorder %v183_v63, 0.0  ;;  %v217_v6 = vmul.f32 0.05, %v183_v63  ;;  %v1539_v7 = vpack.c.bf16 %v223_v1, %v222_v4 }
  0xdf   :  { %vm208_vm6 = vcmp.ge.f32.partialorder %v178_v3, 0.0  ;;  %v216_v8 = vmul.f32 0.05, %v178_v3  ;;  %v1404_v9 = vpop.f32.mrb[4].mxu0 }
  0xe0   :  { %v193_v10 = vadd.f32 %v1404_v9, %v60_v2  ;;  %v187_v11 = vpop.f32.mrb[5].mxu0  ;;  %1540 = vmatprep.subr.bf16.mxu1 %v1539_v7  ;;  %v225_v12 = vsel %vm209_vm5, %v183_v63, %v217_v6 }
  0xe1   :  { %v188_v13 = vadd.f32 %v187_v11, %v55_v5  ;;  %1542 = vmatpush3.bf16.msra.mxu1 %v1539_v7  ;;  %v224_v14 = vsel %vm208_vm6, %v178_v3, %v216_v8  ;;  %v286_v5 = vpop.permute.xlu1 %285  ;;  %v281_v8 = vpop.permute.xlu0 %280 }
  0xe2   :  { %vm211_vm7 = vcmp.ge.f32.partialorder %v193_v10, 0.0  ;;  %v219_v15 = vmul.f32 0.05, %v193_v10  ;;  %v1543_v16 = vpack.c.bf16 %v225_v12, %v224_v14 }
  0xe3   :  { %vm210_vm8 = vcmp.ge.f32.partialorder %v188_v13, 0.0  ;;  %v218_v18 = vmul.f32 0.05, %v188_v13  ;;  %v1407_v19 = vpop.f32.mrb[6].mxu0 }
  0xe4   :  { %v203_v21 = vadd.f32 %v1407_v19, %v70_v17  ;;  %v197_v22 = vpop.f32.mrb[7].mxu0  ;;  %1544 = vmatprep.subr.bf16.mxu1 %v1543_v16  ;;  %v227_v23 = vsel %vm211_vm7, %v193_v10, %v219_v15 }
  0xe5   :  { %v198_v24 = vadd.f32 %v197_v22, %v65_v20  ;;  %1546 = vmatpush3.bf16.msra.mxu1 %v1543_v16  ;;  %v226_v25 = vsel %vm210_vm8, %v188_v13, %v218_v18  ;;  %v1230_v20 = vld [vmem:[%s2006_s1 + $0x88] sm:$0xff]  ;;  %v1232_v22 = vld [vmem:[%s2006_s1 + $0x98] sm:$0xff] }
  0xe6   :  { %vm213_vm9 = vcmp.ge.f32.partialorder %v203_v21, 0.0  ;;  %v221_v26 = vmul.f32 0.05, %v203_v21  ;;  %v1547_v27 = vpack.c.bf16 %v227_v23, %v226_v25  ;;  %v1233_v23 = vld [vmem:[%s2006_s1 + $0xa0] sm:$0xff]  ;;  %v1235_v25 = vld [vmem:[%s2006_s1 + $0xb0] sm:$0xff] }
  0xe7   :  { %vm212_vm10 = vcmp.ge.f32.partialorder %v198_v24, 0.0  ;;  %v220_v28 = vmul.f32 0.05, %v198_v24 }
  0xe8   :  { %1548 = vmatprep.subr.bf16.mxu1 %v1547_v27  ;;  %v229_v29 = vsel %vm213_vm9, %v203_v21, %v221_v26  ;;  %v1231_v21 = vld [vmem:[%s2006_s1 + $0x90] sm:$0xff]  ;;  %v1236_v26 = vld [vmem:[%s2006_s1 + $0xb8] sm:$0xff] }
  0xe9   :  { %1550 = vmatpush3.bf16.msra.mxu1 %v1547_v27  ;;  %v228_v30 = vsel %vm212_vm10, %v198_v24, %v220_v28  ;;  %v1234_v24 = vld [vmem:[%s2006_s1 + $0xa8] sm:$0xff]  ;;  %v1261_v27 = vld [vmem:[%s2006_s1 + $0xc0] sm:$0xff]  ;;  %v468_v28 = vpop.permute.xlu1 %467 }
  0xea   :  { %v1551_v31 = vpack.c.bf16 %v229_v29, %v228_v30  ;;  %v463_v29 = vpop.permute.xlu0 %462 }
  0xec   :  { %1552 = vmatprep.subr.bf16.mxu1 %v1551_v31 }
  0xed   :  { %1554 = vmatpush3.bf16.msra.mxu1 %v1551_v31  ;;  %v478_v30 = vpop.permute.xlu1 %477 }
  0xf0   :  { %1425 = vmatmul.mubr.msk.f32.vlgmr.msra.gmra.mrb[0].mxu1 %vm288_vm2, %v1206_v32  ;;  %v473_v32 = vpop.permute.xlu0 %472 }
  0xf1   :  { %1427 = vmatprep.mubr.msk.f32.mxu1 %vm288_vm2, %v1207_v33 }
  0xf4   :  { %1428 = vmatmul.mubr.msk.f32.gmra.mrb[2].mxu1 %vm288_vm2, %v1208_v34 }
  0xf5   :  { %1430 = vmatprep.mubr.msk.f32.mxu1 %vm288_vm2, %v1209_v35 }
  0xf8   :  { %1431 = vmatmul.mubr.msk.f32.gmra.mrb[4].mxu1 %vm288_vm2, %v1210_v36 }
  0xf9   :  { %1433 = vmatprep.mubr.msk.f32.mxu1 %vm288_vm2, %v1211_v37 }
  0xfc   :  { %1434 = vmatmul.mubr.msk.f32.gmra.mrb[6].mxu1 %vm288_vm2, %v1212_v38 }
  0xfd   :  { %1480 = vmatprep.mubr.msk.f32.mxu1 %vm288_vm2, %v1261_v27  ;;  %v1265_v27 = vld [vmem:[%s2006_s1 + $0xe0] sm:$0xff] }
 0x1c3   :  { %v1426_v43 = vpop.f32.mrb[0].mxu1 }
 0x1c4   :  { %v385_v45 = vadd.f32 %v1426_v43, %v256_v40  ;;  %v379_v46 = vpop.f32.mrb[1].mxu1  ;;  %v483_v43 = vpop.permute.xlu0 %482 }
 0x1c5   :  { %v380_v47 = vadd.f32 %v379_v46, %v251_v41  ;;  %v488_v41 = vpop.permute.xlu1 %487 }
 0x1c6   :  { %vm419_vm11 = vcmp.ge.f32.partialorder %v385_v45, 0.0  ;;  %v427_v48 = vmul.f32 0.05, %v385_v45 }
 0x1c7   :  { %vm418_vm12 = vcmp.ge.f32.partialorder %v380_v47, 0.0  ;;  %v426_v49 = vmul.f32 0.05, %v380_v47  ;;  %v1429_v50 = vpop.f32.mrb[2].mxu1 }
 0x1c8   :  { %v395_v51 = vadd.f32 %v1429_v50, %v266_v42  ;;  %v389_v52 = vpop.f32.mrb[3].mxu1  ;;  %v435_v53 = vsel %vm419_vm11, %v385_v45, %v427_v48 }
 0x1c9   :  { %v390_v55 = vadd.f32 %v389_v52, %v261_v44  ;;  %v434_v56 = vsel %vm418_vm12, %v380_v47, %v426_v49  ;;  %vm1680_vm12 = vmmov 0  }
 0x1ca   :  { %vm421_vm13 = vcmp.ge.f32.partialorder %v395_v51, 0.0  ;;  %v429_v58 = vmul.f32 0.05, %v395_v51  ;;  %v1555_v59 = vpack.c.bf16 %v435_v53, %v434_v56 }
 0x1cb   :  { %vm420_vm14 = vcmp.ge.f32.partialorder %v390_v55, 0.0  ;;  %v428_v60 = vmul.f32 0.05, %v390_v55  ;;  %v1432_v61 = vpop.f32.mrb[4].mxu1 }
 0x1cc   :  { %v405_v62 = vadd.f32 %v1432_v61, %v276_v54  ;;  %v399_v63 = vpop.f32.mrb[5].mxu1  ;;  %1556 = vmatprep.subr.bf16.mxu0 %v1555_v59  ;;  %v437_v0 = vsel %vm421_vm13, %v395_v51, %v429_v58  ;;  %v498_v51 = vpop.permute.xlu1 %497 }
 0x1cd   :  { %v400_v1 = vadd.f32 %v399_v63, %v271_v57  ;;  %1558 = vmatpush3.bf16.msra.mxu0 %v1555_v59  ;;  %v436_v2 = vsel %vm420_vm14, %v390_v55, %v428_v60  ;;  %v493_v54 = vpop.permute.xlu0 %492 }
 0x1ce   :  { %vm423_vm15 = vcmp.ge.f32.partialorder %v405_v62, 0.0  ;;  %v431_v3 = vmul.f32 0.05, %v405_v62  ;;  %v1559_v4 = vpack.c.bf16 %v437_v0, %v436_v2 }
 0x1cf   :  { %vm422_vm0 = vcmp.ge.f32.partialorder %v400_v1, 0.0  ;;  %v430_v6 = vmul.f32 0.05, %v400_v1  ;;  %v1435_v7 = vpop.f32.mrb[6].mxu1 }
 0x1d0   :  { %v415_v9 = vadd.f32 %v1435_v7, %v286_v5  ;;  %v409_v10 = vpop.f32.mrb[7].mxu1  ;;  %1560 = vmatprep.subr.bf16.mxu0 %v1559_v4  ;;  %v439_v11 = vsel %vm423_vm15, %v405_v62, %v431_v3 }
 0x1d1   :  { %v410_v12 = vadd.f32 %v409_v10, %v281_v8  ;;  %1562 = vmatpush3.bf16.msra.mxu0 %v1559_v4  ;;  %v438_v13 = vsel %vm422_vm0, %v400_v1, %v430_v6 }
 0x1d2   :  { %vm425_vm1 = vcmp.ge.f32.partialorder %v415_v9, 0.0  ;;  %v433_v14 = vmul.f32 0.05, %v415_v9  ;;  %v1563_v15 = vpack.c.bf16 %v439_v11, %v438_v13 }
 0x1d3   :  { %vm424_vm3 = vcmp.ge.f32.partialorder %v410_v12, 0.0  ;;  %v432_v16 = vmul.f32 0.05, %v410_v12 }
 0x1d4   :  { %1564 = vmatprep.subr.bf16.mxu0 %v1563_v15  ;;  %v441_v17 = vsel %vm425_vm1, %v415_v9, %v433_v14 }
 0x1d5   :  { %1566 = vmatpush3.bf16.msra.mxu0 %v1563_v15  ;;  %v440_v18 = vsel %vm424_vm3, %v410_v12, %v432_v16 }
 0x1d6   :  { %v1567_v19 = vpack.c.bf16 %v441_v17, %v440_v18 }
 0x1d8   :  { %1568 = vmatprep.subr.bf16.mxu0 %v1567_v19 }
 0x1d9   :  { %1570 = vmatpush3.bf16.msra.mxu0 %v1567_v19 }
 0x1dc   :  { %1453 = vmatmul.mubr.msk.f32.vlgmr.msra.gmra.mrb[8].mxu0 %vm288_vm2, %v1230_v20 }
 0x1dd   :  { %1455 = vmatprep.mubr.msk.f32.mxu0 %vm288_vm2, %v1231_v21 }
 0x1e0   :  { %1456 = vmatmul.mubr.msk.f32.gmra.mrb[10].mxu0 %vm288_vm2, %v1232_v22 }
 0x1e1   :  { %1458 = vmatprep.mubr.msk.f32.mxu0 %vm288_vm2, %v1233_v23 }
 0x1e4   :  { %1459 = vmatmul.mubr.msk.f32.gmra.mrb[12].mxu0 %vm288_vm2, %v1234_v24  ;;  %v1262_v24 = vld [vmem:[%s2006_s1 + $0xc8] sm:$0xff] }
 0x1e5   :  { %1461 = vmatprep.mubr.msk.f32.mxu0 %vm288_vm2, %v1235_v25  ;;  %v1263_v25 = vld [vmem:[%s2006_s1 + $0xd0] sm:$0xff] }
 0x1e8   :  { %1462 = vmatmul.mubr.msk.f32.gmra.mrb[14].mxu0 %vm288_vm2, %v1236_v26  ;;  %v1264_v26 = vld [vmem:[%s2006_s1 + $0xd8] sm:$0xff] }
 0x2af   :  { %v1454_v31 = vpop.f32.mrb[8].mxu0 }
 0x2b0   :  { %v596_v33 = vadd.f32 %v1454_v31, %v468_v28  ;;  %v590_v34 = vpop.f32.mrb[9].mxu0  ;;  %v1266_v28 = vld [vmem:[%s2006_s1 + $0xe8] sm:$0xff]  ;;  %v1285_v31 = vld [vmem:[%s2006_s1 + $0x100] sm:$0xff] }
 0x2b1   :  { %v591_v35 = vadd.f32 %v590_v34, %v463_v29  ;;  %v1267_v29 = vld [vmem:[%s2006_s1 + $0xf0] sm:$0xff]  ;;  %1508 = vmatprep.mubr.msk.f32.mxu0 %vm288_vm2, %v1285_v31 }
 0x2b2   :  { %v1254_v36 = vmul.f32 -1.442695, %v596_v33  ;;  %v698_v33 = vpop.permute.xlu0 %697 }
 0x2b3   :  { %v1253_v37 = vmul.f32 -1.442695, %v591_v35  ;;  %v1457_v38 = vpop.f32.mrb[10].mxu0 }
 0x2b4   :  { %1622 = vpow2.f32 %v1254_v36  ;;  %v606_v39 = vadd.f32 %v1457_v38, %v478_v30  ;;  %v600_v40 = vpop.f32.mrb[11].mxu0  ;;  %v1268_v30 = vld [vmem:[%s2006_s1 + $0xf8] sm:$0xff] }
 0x2b5   :  { %1624 = vpow2.f32 %v1253_v37  ;;  %v601_v42 = vadd.f32 %v600_v40, %v473_v32  ;;  %v703_v32 = vpop.permute.xlu1 %702 }
 0x2b6   :  { %v1256_v44 = vmul.f32 -1.442695, %v606_v39  ;;  %v708_v36 = vpop.permute.xlu0 %707 }
 0x2b7   :  { %v1255_v45 = vmul.f32 -1.442695, %v601_v42  ;;  %v1460_v46 = vpop.f32.mrb[12].mxu0 }
 0x2b8   :  { %1626 = vpow2.f32 %v1256_v44  ;;  %v616_v47 = vadd.f32 %v1460_v46, %v488_v41  ;;  %v610_v48 = vpop.f32.mrb[13].mxu0 }
 0x2b9   :  { %1628 = vpow2.f32 %v1255_v45  ;;  %v611_v49 = vadd.f32 %v610_v48, %v483_v43  ;;  %v713_v34 = vpop.permute.xlu1 %712 }
 0x2ba   :  { %v1258_v50 = vmul.f32 -1.442695, %v616_v47 }
 0x2bb   :  { %v1257_v52 = vmul.f32 -1.442695, %v611_v49  ;;  %v1463_v53 = vpop.f32.mrb[14].mxu0  ;;  %v718_v49 = vpop.permute.xlu0 %717 }
 0x2bc   :  { %1630 = vpow2.f32 %v1258_v50  ;;  %v626_v55 = vadd.f32 %v1463_v53, %v498_v51  ;;  %v620_v56 = vpop.f32.mrb[15].mxu0 }
 0x2bd   :  { %1632 = vpow2.f32 %v1257_v52  ;;  %v621_v57 = vadd.f32 %v620_v56, %v493_v54  ;;  %v723_v46 = vpop.permute.xlu1 %722 }
 0x2be   :  { %v1623_v58 = vpop.eup %1622  ;;  %v1260_v59 = vmul.f32 -1.442695, %v626_v55 }
 0x2bf   :  { %v1625_v60 = vpop.eup %1624  ;;  %v654_v61 = vadd.f32 1.0, %v1623_v58  ;;  %v1259_v62 = vmul.f32 -1.442695, %v621_v57 }
 0x2c0   :  { %v653_v63 = vadd.f32 1.0, %v1625_v60  ;;  %1634 = vpow2.f32 %v1260_v59 }
 0x2c1   :  { %1636 = vrcp.f32 %v654_v61  ;;  %v733_v61 = vpop.permute.xlu1 %732 }
 0x2c2   :  { %v1627_v0 = vpop.eup %1626  ;;  %1638 = vrcp.f32 %v653_v63 }
 0x2c3   :  { %v1629_v1 = vpop.eup %1628  ;;  %v656_v2 = vadd.f32 1.0, %v1627_v0  ;;  %1640 = vpow2.f32 %v1259_v62  ;;  %v728_v0 = vpop.permute.xlu0 %727 }
 0x2c4   :  { %v655_v3 = vadd.f32 1.0, %v1629_v1 }
 0x2c5   :  { %1642 = vrcp.f32 %v656_v2 }
 0x2c6   :  { %v1631_v4 = vpop.eup %1630  ;;  %1644 = vrcp.f32 %v655_v3 }
 0x2c7   :  { %v1633_v5 = vpop.eup %1632  ;;  %v658_v6 = vadd.f32 1.0, %v1631_v4 }
 0x2c8   :  { %v657_v7 = vadd.f32 1.0, %v1633_v5 }
 0x2c9   :  { %1646 = vrcp.f32 %v658_v6 }
 0x2ca   :  { %v1635_v8 = vpop.eup %1634  ;;  %1648 = vrcp.f32 %v657_v7 }
 0x2cb   :  { %v1637_v9 = vpop.eup %1636  ;;  %v660_v10 = vadd.f32 1.0, %v1635_v8 }
 0x2cc   :  { %v1639_v11 = vpop.eup %1638 }
 0x2cd   :  { %v1641_v12 = vpop.eup %1640  ;;  %v1571_v13 = vpack.c.bf16 %v1637_v9, %v1639_v11  ;;  %1650 = vrcp.f32 %v660_v10 }
 0x2ce   :  { %v659_v14 = vadd.f32 1.0, %v1641_v12  ;;  %v1286_v12 = vld [vmem:[%s2006_s1 + $0x108] sm:$0xff] }
 0x2cf   :  { %v1643_v15 = vpop.eup %1642  ;;  %1572 = vmatprep.subr.bf16.mxu1 %v1571_v13 }
 0x2d0   :  { %v1645_v16 = vpop.eup %1644  ;;  %1652 = vrcp.f32 %v659_v14  ;;  %1574 = vmatpush3.bf16.msra.mxu1 %v1571_v13  ;;  %v1287_v13 = vld [vmem:[%s2006_s1 + $0x110] sm:$0xff]  ;;  %v1288_v14 = vld [vmem:[%s2006_s1 + $0x118] sm:$0xff] }
 0x2d1   :  { %v1575_v17 = vpack.c.bf16 %v1643_v15, %v1645_v16  ;;  %v1289_v15 = vld [vmem:[%s2006_s1 + $0x120] sm:$0xff]  ;;  %v1290_v16 = vld [vmem:[%s2006_s1 + $0x128] sm:$0xff] }
 0x2d3   :  { %v1647_v18 = vpop.eup %1646  ;;  %1576 = vmatprep.subr.bf16.mxu1 %v1575_v17 }
 0x2d4   :  { %v1649_v19 = vpop.eup %1648  ;;  %1578 = vmatpush3.bf16.msra.mxu1 %v1575_v17  ;;  %v1291_v17 = vld [vmem:[%s2006_s1 + $0x130] sm:$0xff] }
 0x2d5   :  { %v1579_v20 = vpack.c.bf16 %v1647_v18, %v1649_v19  ;;  %v1292_v18 = vld [vmem:[%s2006_s1 + $0x138] sm:$0xff]  ;;  %v1679_v19 = vmov 0.0|0.0  }
 0x2d7   :  { %1580 = vmatprep.subr.bf16.mxu1 %v1579_v20  ;;  %v1651_v21 = vpop.eup %1650 }
 0x2d8   :  { %1582 = vmatpush3.bf16.msra.mxu1 %v1579_v20  ;;  %v1681_v20 = vmov 0.0  }
 0x2da   :  { %v1653_v22 = vpop.eup %1652 }
 0x2db   :  { %v1583_v23 = vpack.c.bf16 %v1651_v21, %v1653_v22  ;;  %v914_v21 = vpop.permute.xlu1 %913  ;;  %v909_v22 = vpop.permute.xlu0 %908 }
 0x2dd   :  { %1584 = vmatprep.subr.bf16.mxu1 %v1583_v23 }
 0x2de   :  { %1586 = vmatpush3.bf16.msra.mxu1 %v1583_v23 }
 0x2df   :  { %1603 = vmatprep.subr.bf16.mxu1 %v1679_v19  ;;  %v924_v23 = vpop.permute.xlu1 %923 }
 0x2e1   :  { %1481 = vmatmul.mubr.msk.f32.vlgmr.msra.gmra.mrb[8].mxu1 %vm288_vm2, %v1262_v24 }
 0x2e2   :  { %1483 = vmatprep.mubr.msk.f32.mxu1 %vm288_vm2, %v1263_v25  ;;  %v919_v25 = vpop.permute.xlu0 %918 }
 0x2e5   :  { %1484 = vmatmul.mubr.msk.f32.gmra.mrb[10].mxu1 %vm288_vm2, %v1264_v26 }
 0x2e6   :  { %1486 = vmatprep.mubr.msk.f32.mxu1 %vm288_vm2, %v1265_v27 }
 0x2e9   :  { %1487 = vmatmul.mubr.msk.f32.gmra.mrb[12].mxu1 %vm288_vm2, %v1266_v28 }
 0x2ea   :  { %1489 = vmatprep.mubr.msk.f32.mxu1 %vm288_vm2, %v1267_v29 }
 0x2ed   :  { %1490 = vmatmul.mubr.msk.f32.gmra.mrb[14].mxu1 %vm288_vm2, %v1268_v30 }
 0x2ee   :  { %1536 = vmatprep.mubr.msk.f32.mxu1 %vm1680_vm12, %v1681_v20 }
 0x3b4   :  { %v1482_v35 = vpop.f32.mrb[8].mxu1 }
 0x3b5   :  { %v831_v37 = vadd.f32 %v1482_v35, %v703_v32  ;;  %v825_v38 = vpop.f32.mrb[9].mxu1  ;;  %v934_v35 = vpop.permute.xlu1 %933 }
 0x3b6   :  { %v826_v39 = vadd.f32 %v825_v38, %v698_v33  ;;  %v929_v38 = vpop.permute.xlu0 %928 }
 0x3b7   :  { %vm865_vm4 = vcmp.ge.f32.partialorder %v831_v37, 0.0  ;;  %v873_v40 = vmul.f32 0.05, %v831_v37 }
 0x3b8   :  { %vm864_vm5 = vcmp.ge.f32.partialorder %v826_v39, 0.0  ;;  %v872_v41 = vmul.f32 0.05, %v826_v39  ;;  %v1485_v42 = vpop.f32.mrb[10].mxu1 }
 0x3b9   :  { %v841_v43 = vadd.f32 %v1485_v42, %v713_v34  ;;  %v835_v44 = vpop.f32.mrb[11].mxu1  ;;  %v881_v45 = vsel %vm865_vm4, %v831_v37, %v873_v40 }
 0x3ba   :  { %v836_v47 = vadd.f32 %v835_v44, %v708_v36  ;;  %v880_v48 = vsel %vm864_vm5, %v826_v39, %v872_v41 }
 0x3bb   :  { %vm867_vm6 = vcmp.ge.f32.partialorder %v841_v43, 0.0  ;;  %v875_v50 = vmul.f32 0.05, %v841_v43  ;;  %v1587_v51 = vpack.c.bf16 %v881_v45, %v880_v48 }
 0x3bc   :  { %vm866_vm7 = vcmp.ge.f32.partialorder %v836_v47, 0.0  ;;  %v874_v52 = vmul.f32 0.05, %v836_v47  ;;  %v1488_v53 = vpop.f32.mrb[12].mxu1 }
 0x3bd   :  { %v851_v54 = vadd.f32 %v1488_v53, %v723_v46  ;;  %v845_v55 = vpop.f32.mrb[13].mxu1  ;;  %1588 = vmatprep.subr.bf16.mxu0 %v1587_v51  ;;  %v883_v56 = vsel %vm867_vm6, %v841_v43, %v875_v50  ;;  %v944_v50 = vpop.permute.xlu1 %943 }
 0x3be   :  { %v846_v57 = vadd.f32 %v845_v55, %v718_v49  ;;  %1590 = vmatpush3.bf16.msra.mxu0 %v1587_v51  ;;  %v882_v58 = vsel %vm866_vm7, %v836_v47, %v874_v52  ;;  %v939_v53 = vpop.permute.xlu0 %938 }
 0x3bf   :  { %vm869_vm8 = vcmp.ge.f32.partialorder %v851_v54, 0.0  ;;  %v877_v59 = vmul.f32 0.05, %v851_v54  ;;  %v1591_v60 = vpack.c.bf16 %v883_v56, %v882_v58 }
 0x3c0   :  { %vm868_vm9 = vcmp.ge.f32.partialorder %v846_v57, 0.0  ;;  %v876_v62 = vmul.f32 0.05, %v846_v57  ;;  %v1491_v63 = vpop.f32.mrb[14].mxu1 }
 0x3c1   :  { %v861_v1 = vadd.f32 %v1491_v63, %v733_v61  ;;  %v855_v2 = vpop.f32.mrb[15].mxu1  ;;  %1592 = vmatprep.subr.bf16.mxu0 %v1591_v60  ;;  %v885_v3 = vsel %vm869_vm8, %v851_v54, %v877_v59 }
 0x3c2   :  { %v856_v4 = vadd.f32 %v855_v2, %v728_v0  ;;  %1594 = vmatpush3.bf16.msra.mxu0 %v1591_v60  ;;  %v884_v5 = vsel %vm868_vm9, %v846_v57, %v876_v62  ;;  %v1106_v2 = vpop.permute.xlu0 %1105 }
 0x3c3   :  { %vm871_vm10 = vcmp.ge.f32.partialorder %v861_v1, 0.0  ;;  %v879_v6 = vmul.f32 0.05, %v861_v1  ;;  %v1595_v7 = vpack.c.bf16 %v885_v3, %v884_v5 }
 0x3c4   :  { %vm870_vm11 = vcmp.ge.f32.partialorder %v856_v4, 0.0  ;;  %v878_v8 = vmul.f32 0.05, %v856_v4 }
 0x3c5   :  { %1596 = vmatprep.subr.bf16.mxu0 %v1595_v7  ;;  %v887_v9 = vsel %vm871_vm10, %v861_v1, %v879_v6  ;;  %v1309_v1 = vld [vmem:[%s2006_s1 + $0x140] sm:$0xff] }
 0x3c6   :  { %1598 = vmatpush3.bf16.msra.mxu0 %v1595_v7  ;;  %v886_v10 = vsel %vm870_vm11, %v856_v4, %v878_v8 }
 0x3c7   :  { %v1599_v11 = vpack.c.bf16 %v887_v9, %v886_v10 }
 0x3c9   :  { %1600 = vmatprep.subr.bf16.mxu0 %v1599_v11 }
 0x3ca   :  { %1602 = vmatpush3.bf16.msra.mxu0 %v1599_v11 }
 0x3cd   :  { %1509 = vmatmul.mubr.msk.f32.vlgmr.msra.gmra.mrb[16].mxu0 %vm288_vm2, %v1286_v12 }
 0x3ce   :  { %1511 = vmatprep.mubr.msk.f32.mxu0 %vm288_vm2, %v1287_v13 }
 0x3d1   :  { %1512 = vmatmul.mubr.msk.f32.gmra.mrb[18].mxu0 %vm288_vm2, %v1288_v14 }
 0x3d2   :  { %1514 = vmatprep.mubr.msk.f32.mxu0 %vm288_vm2, %v1289_v15 }
 0x3d5   :  { %1515 = vmatmul.mubr.msk.f32.gmra.mrb[20].mxu0 %vm288_vm2, %v1290_v16 }
 0x3d6   :  { %1517 = vmatprep.mubr.msk.f32.mxu0 %vm288_vm2, %v1291_v17 }
 0x3d9   :  { %1518 = vmatmul.mubr.msk.f32.gmra.mrb[22].mxu0 %vm288_vm2, %v1292_v18 }
 0x4a0   :  { %v1510_v24 = vpop.f32.mrb[16].mxu0 }
 0x4a1   :  { %v1042_v26 = vadd.f32 %v1510_v24, %v914_v21  ;;  %v1036_v27 = vpop.f32.mrb[17].mxu0 }
 0x4a2   :  { %v1037_v28 = vadd.f32 %v1036_v27, %v909_v22 }
 0x4a3   :  { %vm1076_vm13 = vcmp.ge.f32.partialorder %v1042_v26, 0.0  ;;  %v1084_v29 = vmul.f32 0.05, %v1042_v26 }
 0x4a4   :  { %vm1075_vm14 = vcmp.ge.f32.partialorder %v1037_v28, 0.0  ;;  %v1083_v30 = vmul.f32 0.05, %v1037_v28  ;;  %v1513_v31 = vpop.f32.mrb[18].mxu0 }
 0x4a5   :  { %v1092_v32 = vsel %vm1076_vm13, %v1042_v26, %v1084_v29  ;;  %v1052_v33 = vadd.f32 %v1513_v31, %v924_v23  ;;  %v1046_v34 = vpop.f32.mrb[19].mxu0 }
 0x4a6   :  { %v1091_v36 = vsel %vm1075_vm14, %v1037_v28, %v1083_v30  ;;  %v1047_v37 = vadd.f32 %v1046_v34, %v919_v25 }
 0x4a7   :  { %v1604_v39 = vpack.c.bf16 %v1092_v32, %v1091_v36  ;;  %vm1078_vm15 = vcmp.ge.f32.partialorder %v1052_v33, 0.0  ;;  %v1086_v40 = vmul.f32 0.05, %v1052_v33 }
 0x4a8   :  { %vm1077_vm0 = vcmp.ge.f32.partialorder %v1047_v37, 0.0  ;;  %v1085_v41 = vmul.f32 0.05, %v1047_v37  ;;  %v1516_v42 = vpop.f32.mrb[20].mxu0 }
 0x4a9   :  { %v1094_v43 = vsel %vm1078_vm15, %v1052_v33, %v1086_v40  ;;  %v1062_v44 = vadd.f32 %v1516_v42, %v934_v35  ;;  %v1056_v45 = vpop.f32.mrb[21].mxu0  ;;  %1605 = vmatpush3.bf16.msra.mxu1 %v1604_v39 }
 0x4aa   :  { %v1093_v46 = vsel %vm1077_vm0, %v1047_v37, %v1085_v41  ;;  %v1057_v47 = vadd.f32 %v1056_v45, %v929_v38  ;;  %1606 = vmatprep.subr.bf16.mxu1 %v1679_v19 }
 0x4ab   :  { %v1607_v48 = vpack.c.bf16 %v1094_v43, %v1093_v46  ;;  %vm1080_vm1 = vcmp.ge.f32.partialorder %v1062_v44, 0.0  ;;  %v1088_v49 = vmul.f32 0.05, %v1062_v44 }
 0x4ac   :  { %vm1079_vm3 = vcmp.ge.f32.partialorder %v1057_v47, 0.0  ;;  %v1087_v51 = vmul.f32 0.05, %v1057_v47  ;;  %v1519_v52 = vpop.f32.mrb[22].mxu0 }
 0x4ad   :  { %v1096_v54 = vsel %vm1080_vm1, %v1062_v44, %v1088_v49  ;;  %v1072_v55 = vadd.f32 %v1519_v52, %v944_v50  ;;  %v1066_v56 = vpop.f32.mrb[23].mxu0  ;;  %1608 = vmatpush3.bf16.msra.mxu1 %v1607_v48 }
 0x4ae   :  { %v1095_v57 = vsel %vm1079_vm3, %v1057_v47, %v1087_v51  ;;  %v1067_v58 = vadd.f32 %v1066_v56, %v939_v53  ;;  %1609 = vmatprep.subr.bf16.mxu1 %v1679_v19 }
 0x4af   :  { %v1610_v59 = vpack.c.bf16 %v1096_v54, %v1095_v57  ;;  %vm1082_vm4 = vcmp.ge.f32.partialorder %v1072_v55, 0.0  ;;  %v1090_v60 = vmul.f32 0.05, %v1072_v55 }
 0x4b0   :  { %vm1081_vm5 = vcmp.ge.f32.partialorder %v1067_v58, 0.0  ;;  %v1089_v61 = vmul.f32 0.05, %v1067_v58 }
 0x4b1   :  { %v1098_v62 = vsel %vm1082_vm4, %v1072_v55, %v1090_v60  ;;  %1611 = vmatpush3.bf16.msra.mxu1 %v1610_v59 }
 0x4b2   :  { %v1097_v63 = vsel %vm1081_vm5, %v1067_v58, %v1089_v61  ;;  %1612 = vmatprep.subr.bf16.mxu1 %v1679_v19 }
 0x4b3   :  { %v1613_v0 = vpack.c.bf16 %v1098_v62, %v1097_v63 }
 0x4b5   :  { %1614 = vmatpush3.bf16.msra.mxu1 %v1613_v0 }
 0x4b8   :  { %1537 = vmatmul.mubr.msk.f32.vlgmr.msra.gmra.mrb[16].mxu1 %vm288_vm2, %v1309_v1 }
 0x58b   :  { %v1177_v3 = vpop.f32.mrb[16].mxu1 }
 0x58c   :  { %v1178_v4 = vadd.f32 %v1177_v3, %v1106_v2  ;;  %v1538_v5 = vpop.f32.mrb[17].mxu1 }
 0x58e   :  { %1181 = vst [vmem:[#allocation2] sm:$0xf] %v1178_v4 }
 0x58f   :  { %1665 = shalt.err (!%p1662_p4)
}
 0x590   :  { %s1666_s1 = scalar_lea.hbm %s2008_s3, 64 }
 0x591   :  { %p1667_p5 = scmp.ne.s32.totalorder %s2008_s3, %s1666_s1  ;;  %p1670_p6 = scmp.lt.u32.totalorder %s1666_s1, %s2008_s3 }
 0x593   :  { %p1672_p7 = pnand %p1670_p6, %p1667_p5 }
 0x595   :  { %1675 = shalt.err (!%p1672_p7)
}
 0x596   :  { %1191 = dma.vmem_to_hbm [thread:$0]  %s1189_s8, 64, %s2008_s3, [#allocation3]  }
 0x597   :  { %1676 = dma.done.wait [#allocation3], 64  }
 0x598   :  { %1677 = vsyncadd [#allocation3], 4294967232 }
 0x599   :  { %1195 = vsyncpa [#allocation3], 1 }

</bundles_post_ra>
